<compile_context>
chip_gen: v6e
topology: v6e:2x2x1
jax: 0.10.0
libtpu: 0.0.40
codegen_flags: <defaults>
</compile_context>

<pallas_src>
import functools

import jax
import jax.numpy as jnp
from jax.experimental import pallas as pl
from jax.experimental.pallas import tpu as pltpu

_LANES = 128  # vreg lane width (same on v5e / v6e / v7x)


def _pad_v(v):
    """Smallest 'lane friendly' width >= v: a power-of-two divisor of 128, or a multiple of 128."""
    if v >= _LANES:
        return pl.cdiv(v, _LANES) * _LANES
    vp = 1
    while vp < v:
        vp *= 2
    return vp


def _tpu_generation():
    """Best-effort TPU generation number (4/5/6/7); None if it cannot be determined."""
    try:
        kind = jax.devices()[0].device_kind.lower()
    except Exception:
        return None
    for g in (7, 6, 5, 4):
        if (f"v{g}" in kind) or (f"tpu{g}" in kind) or (f"{g}x" in kind):
            return g
    return None


def _kernel(x_ref, w_ref, b_ref, a_ref, o_ref, *,
            num_k, c_out, lanes, num_slabs, fuse_k):
    # x_ref: (1, C_in, S*lanes)        S lane-dense time*vertex slabs for this (n, t) step
    # w_ref: (K*C_out, C_in)           fused 1x1-conv weights (row = k*C_out + c)
    # b_ref: (K*C_out, 1)              fused bias (f32)
    # a_ref: (1, K*lanes, lanes)       vertically stacked block-diagonal graph operator
    # o_ref: (1, C_out, S*lanes)
    b = b_ref[...]

    # Static unroll over the S slabs; A / W stay resident in VMEM and are re-used.
    for s in range(num_slabs):
        xs = x_ref[0, :, s * lanes:(s + 1) * lanes]              # (C_in, lanes), lane-aligned

        # --- channel mixing: one MXU dot for all K kernels of this slab --------------
        y = jnp.dot(w_ref[...], xs, preferred_element_type=jnp.float32)
        y = (y + b).astype(a_ref.dtype)                          # (K*C_out, lanes)

        # --- graph aggregation + reduction over K ------------------------------------
        if fuse_k:
            # Lane-concat the K row-blocks (128-aligned lane offsets, no relayout when
            # C_out % 8 == 0) and do ONE K*128-deep dot (fills the 256-deep MXU).
            y_wide = jnp.concatenate(
                [y[k * c_out:(k + 1) * c_out, :] for k in range(num_k)], axis=1)
            acc = jnp.dot(y_wide, a_ref[0], preferred_element_type=jnp.float32)
        else:
            # Per-k 128-deep dots + accumulate (matches v5e's 128x128 MXU exactly).
            acc = jnp.dot(y[0:c_out, :], a_ref[0, 0:lanes, :],
                          preferred_element_type=jnp.float32)
            for k in range(1, num_k):                            # K is tiny: static unroll
                acc = acc + jnp.dot(y[k * c_out:(k + 1) * c_out, :],
                                    a_ref[0, k * lanes:(k + 1) * lanes, :],
                                    preferred_element_type=jnp.float32)

        # Full 128-lane unmasked stores at 128-aligned offsets.
        o_ref[0, :, s * lanes:(s + 1) * lanes] = acc.astype(o_ref.dtype)


def conv_temporal_graphical(x, A, W, b, *, compute_dtype="auto", out_dtype=None,
                            slabs_per_step=8, fuse_k="auto"):
    """Pallas implementation of ConvTemporalGraphical.forward; returns (out, A)."""
    N, C_in, T, V = x.shape
    K, C_out, _ = W.shape
    a_per_batch = (A.ndim == 4)
    if a_per_batch:
        assert A.shape == (N, K, V, V)
    else:
        assert A.shape == (K, V, V)
    assert b.shape == (K, C_out, 1)

    gen = _tpu_generation()
    if compute_dtype == "auto":
        # bf16 MXU-native on v6e/v7x (f32 accumulation kept); stay f32 elsewhere/unknown.
        compute_dtype = jnp.bfloat16 if (gen is not None and gen >= 6) else None
    if fuse_k == "auto":
        # Depth fusion only pays on the 256-deep MXUs (v6e/v7x) and wants sublane-aligned
        # row blocks; v5e's 128x128 MXU is already matched by the per-k path.
        fuse_k = bool(gen is not None and gen >= 6 and C_out % 8 == 0)
    if out_dtype is None:
        out_dtype = x.dtype

    # ---- lane-dense time tile: TT*Vp == 128 (TT is never grown beyond that) ---------
    Vp = _pad_v(V)
    TT = max(1, _LANES // Vp)
    lanes = TT * Vp

    # ---- multi-slab grid step: S slabs per step, same resident A for all of them ----
    slabs_total = pl.cdiv(T, TT)
    S = int(max(1, min(slabs_per_step, slabs_total)))
    steps_t = pl.cdiv(slabs_total, S)
    Tp = steps_t * S * TT

    # ---- wrapper-side layout plumbing (cheap XLA ops; no compute hoisted) -----------
    x_p = x
    if (Tp, Vp) != (T, V):
        x_p = jnp.pad(x, ((0, 0), (0, 0), (0, Tp - T), (0, Vp - V)))
    x_flat = x_p.reshape(N, C_in, Tp * Vp)                      # lane-dense view (free)

    A_p = A
    if Vp != V:
        pad_nd = ((0, 0),) * (A.ndim - 2) + ((0, Vp - V), (0, Vp - V))
        A_p = jnp.pad(A, pad_nd)
    # Vertically stacked block-diagonal operator: A_stk[.., k*lanes + a*Vp + v, b*Vp + w]
    #   = I_TT[a,b] * A[.., k, v, w].  Tiny: (N or 1)*K*lanes*lanes elements.
    eye = jnp.eye(TT, dtype=A_p.dtype)
    if a_per_batch:
        A_stk = jnp.einsum("ab,nkvw->nkavbw", eye, A_p).reshape(N, K * lanes, lanes)
        a_index = lambda n, t: (n, 0, 0)      # resident across the inner time axis
    else:
        A_stk = jnp.einsum("ab,kvw->kavbw", eye, A_p).reshape(1, K * lanes, lanes)
        a_index = lambda n, t: (0, 0, 0)      # single copy, resident for the whole grid

    W_all = W.reshape(K * C_out, C_in)                          # row index = k*C_out + c
    b_all = b.reshape(K * C_out, 1).astype(jnp.float32)         # added to the f32 accumulator

    if compute_dtype is not None:
        x_flat = x_flat.astype(compute_dtype)
        W_all = W_all.astype(compute_dtype)
        A_stk = A_stk.astype(compute_dtype)

    grid = (N, steps_t)
    kernel = functools.partial(_kernel, num_k=K, c_out=C_out, lanes=lanes,
                               num_slabs=S, fuse_k=fuse_k)

    # Advisory cost for XLA's scheduler: actual MXU work (includes block-diag inflation).
    flops = N * (Tp // TT) * (2 * K * C_out * C_in * lanes + 2 * C_out * K * lanes * lanes)
    bytes_accessed = (x_flat.size * x_flat.dtype.itemsize
                      + A_stk.size * A_stk.dtype.itemsize
                      + W_all.size * W_all.dtype.itemsize
                      + b_all.size * b_all.dtype.itemsize
                      + N * C_out * Tp * Vp * jnp.dtype(out_dtype).itemsize)

    out_flat = pl.pallas_call(
        kernel,
        out_shape=jax.ShapeDtypeStruct((N, C_out, Tp * Vp), out_dtype),
        grid_spec=pltpu.PrefetchScalarGridSpec(
            num_scalar_prefetch=0,
            grid=grid,
            in_specs=[
                pl.BlockSpec((1, C_in, S * lanes), lambda n, t: (n, 0, t)),
                pl.BlockSpec((K * C_out, C_in), lambda n, t: (0, 0)),
                pl.BlockSpec((K * C_out, 1), lambda n, t: (0, 0)),
                pl.BlockSpec((1, K * lanes, lanes), a_index),
            ],
            out_specs=pl.BlockSpec((1, C_out, S * lanes), lambda n, t: (n, 0, t)),
        ),
        compiler_params=pltpu.CompilerParams(
            # No cross-step reduction: both grid axes are independent (dual-TC sharding).
            dimension_semantics=("parallel", "parallel"),
            # Per-step footprint is a few MiB even with S=8 double-buffered blocks;
            # 32 MiB also overrides v5e's 16 MiB scoped default and stays well under
            # v7x's 64 MiB physical VMEM.
            vmem_limit_bytes=32 * 1024 * 1024,
        ),
        cost_estimate=pl.CostEstimate(
            flops=flops, transcendentals=0, bytes_accessed=bytes_accessed),
    )(x_flat, W_all, b_all, A_stk)

    # Slice off padded frames/vertices (padded frames hold bias-derived garbage; padded
    # vertices are exactly zero because A's padded rows/cols are zero).
    out = out_flat.reshape(N, C_out, Tp, Vp)[:, :, :T, :V]
    return out, A


def _reference(x, A, W, b):
    """Pure-JAX reference of the PyTorch forward (supports per-batch or shared A)."""
    y = jnp.einsum("koc,nctv->nkotv", W, x) + b[None, :, :, 0, None, None]
    if A.ndim == 3:
        return jnp.einsum("nkctv,kvw->nctw", y, A)
    return jnp.einsum("nkctv,nkvw->nctw", y, A)


if __name__ == "__main__":
    keys = jax.random.split(jax.random.PRNGKey(0), 12)

    # ---- test 1: f32, per-k graph path, multi-slab inner loop, multi-step time grid --
    N, C_in, C_out, K, T, V = 2, 4, 8, 3, 32, 16
    x = jax.random.normal(keys[0], (N, C_in, T, V), dtype=jnp.float32)
    A = jax.random.normal(keys[1], (N, K, V, V), dtype=jnp.float32)
    W = jax.random.normal(keys[2], (K, C_out, C_in), dtype=jnp.float32) * 0.1
    b = jax.random.normal(keys[3], (K, C_out, 1), dtype=jnp.float32) * 0.1

    out, A_out = conv_temporal_graphical(
        x, A, W, b, compute_dtype=None, fuse_k=False, slabs_per_step=2)
    out = jax.block_until_ready(out)
    ref = _reference(x, A, W, b)
    assert out.shape == (N, C_out, T, V)
    assert jnp.allclose(out, ref, atol=1e-3, rtol=1e-3), "mismatch vs reference (test 1)"
    assert jnp.array_equal(A_out, A)

    # ---- test 2: f32, fused-K graph path, exercises the T/V zero-padding path --------
    N2, C2i, C2o, K2, T2, V2 = 1, 4, 8, 2, 6, 12
    x2 = jax.random.normal(keys[4], (N2, C2i, T2, V2), dtype=jnp.float32)
    A2 = jax.random.normal(keys[5], (N2, K2, V2, V2), dtype=jnp.float32)
    W2 = jax.random.normal(keys[6], (K2, C2o, C2i), dtype=jnp.float32) * 0.1
    b2 = jax.random.normal(keys[7], (K2, C2o, 1), dtype=jnp.float32) * 0.1

    out2, _ = conv_temporal_graphical(x2, A2, W2, b2, compute_dtype=None, fuse_k=True)
    out2 = jax.block_until_ready(out2)
    ref2 = _reference(x2, A2, W2, b2)
    assert out2.shape == (N2, C2o, T2, V2)
    assert jnp.allclose(out2, ref2, atol=1e-3, rtol=1e-3), "mismatch vs reference (test 2)"

    # ---- test 3: auto dtype/fusion, batch-shared A (resident), bf16 output, V=25 -----
    N3, C3i, C3o, K3, T3, V3 = 2, 8, 16, 3, 20, 25
    x3 = jax.random.normal(keys[8], (N3, C3i, T3, V3), dtype=jnp.float32)
    A3 = jax.random.normal(keys[9], (K3, V3, V3), dtype=jnp.float32)
    W3 = jax.random.normal(keys[10], (K3, C3o, C3i), dtype=jnp.float32) * 0.1
    b3 = jax.random.normal(keys[11], (K3, C3o, 1), dtype=jnp.float32) * 0.1

    out3, A3_out = conv_temporal_graphical(x3, A3, W3, b3, out_dtype=jnp.bfloat16)
    out3 = jax.block_until_ready(out3)
    ref3 = _reference(x3, A3, W3, b3)
    assert out3.shape == (N3, C3o, T3, V3)
    assert jnp.allclose(out3.astype(jnp.float32), ref3, atol=5e-2, rtol=5e-2), \
        "mismatch vs reference (test 3, reduced-precision path)"
    assert jnp.array_equal(A3_out, A3)

    print("KERNEL_OK")
</pallas_src>

<mosaic_0001>
module attributes {stable_mosaic.version = 11 : i64} {
  func.func @_kernel(%arg0: i32, %arg1: i32, %arg2: memref<1x4x256xf32, #tpu.memory_space<vmem>>, %arg3: memref<24x4xf32, #tpu.memory_space<vmem>>, %arg4: memref<24x1xf32, #tpu.memory_space<vmem>>, %arg5: memref<1x384x128xf32, #tpu.memory_space<vmem>>, %arg6: memref<1x8x256xf32, #tpu.memory_space<vmem>>) attributes {dimension_semantics = [#tpu.dimension_semantics<parallel>, #tpu.dimension_semantics<parallel>], iteration_bounds = array<i64: 2, 2>, scalar_prefetch = 0 : i64, scratch_operands = 0 : i64, tpu.core_type = #tpu.core_type<tc>, window_params = [{transform_indices = @transform_0, window_bounds = array<i64: 1, 4, 256>}, {pipeline_mode = #tpu.pipeline_mode<synchronous>, transform_indices = @transform_1, window_bounds = array<i64: 24, 4>}, {pipeline_mode = #tpu.pipeline_mode<synchronous>, transform_indices = @transform_2, window_bounds = array<i64: 24, 1>}, {transform_indices = @transform_3, window_bounds = array<i64: 1, 384, 128>}, {transform_indices = @transform_4, window_bounds = array<i64: 1, 8, 256>}]} {
    %c0 = arith.constant 0 : index
    %c0_0 = arith.constant 0 : index
    %0 = vector.load %arg4[%c0, %c0_0] : memref<24x1xf32, #tpu.memory_space<vmem>>, vector<24x1xf32>
    %c0_1 = arith.constant 0 : index
    %c0_2 = arith.constant 0 : index
    %c0_3 = arith.constant 0 : index
    %1 = vector.load %arg2[%c0_1, %c0_2, %c0_3] : memref<1x4x256xf32, #tpu.memory_space<vmem>>, vector<1x4x128xf32>
    %2 = vector.shape_cast %1 : vector<1x4x128xf32> to vector<4x128xf32>
    %c0_4 = arith.constant 0 : index
    %c0_5 = arith.constant 0 : index
    %3 = vector.load %arg3[%c0_4, %c0_5] : memref<24x4xf32, #tpu.memory_space<vmem>>, vector<24x4xf32>
    %cst = arith.constant dense<0.000000e+00> : vector<24x128xf32>
    %4 = tpu.matmul %3, %2, %cst {dimension_numbers = #tpu.dot_dimension_numbers<[1], [0], [0], [1], [0, 0, 1, 1], [], []>} : vector<24x4xf32>, vector<4x128xf32>, vector<24x128xf32> -> vector<24x128xf32>
    %5 = vector.broadcast %0 : vector<24x1xf32> to vector<24x128xf32>
    %6 = arith.addf %4, %5 : vector<24x128xf32>
    %7 = vector.extract_strided_slice %6 {offsets = [0, 0], sizes = [8, 128], strides = [1, 1]} : vector<24x128xf32> to vector<8x128xf32>
    %c0_6 = arith.constant 0 : index
    %c0_7 = arith.constant 0 : index
    %c0_8 = arith.constant 0 : index
    %8 = vector.load %arg5[%c0_6, %c0_7, %c0_8] : memref<1x384x128xf32, #tpu.memory_space<vmem>>, vector<1x128x128xf32>
    %9 = vector.shape_cast %8 : vector<1x128x128xf32> to vector<128x128xf32>
    %cst_9 = arith.constant dense<0.000000e+00> : vector<8x128xf32>
    %10 = tpu.matmul %7, %9, %cst_9 {dimension_numbers = #tpu.dot_dimension_numbers<[1], [0], [0], [1], [0, 0, 1, 1], [], []>} : vector<8x128xf32>, vector<128x128xf32>, vector<8x128xf32> -> vector<8x128xf32>
    %11 = vector.extract_strided_slice %6 {offsets = [8, 0], sizes = [8, 128], strides = [1, 1]} : vector<24x128xf32> to vector<8x128xf32>
    %c0_10 = arith.constant 0 : index
    %c128 = arith.constant 128 : index
    %c0_11 = arith.constant 0 : index
    %12 = vector.load %arg5[%c0_10, %c128, %c0_11] : memref<1x384x128xf32, #tpu.memory_space<vmem>>, vector<1x128x128xf32>
    %13 = vector.shape_cast %12 : vector<1x128x128xf32> to vector<128x128xf32>
    %cst_12 = arith.constant dense<0.000000e+00> : vector<8x128xf32>
    %14 = tpu.matmul %11, %13, %cst_12 {dimension_numbers = #tpu.dot_dimension_numbers<[1], [0], [0], [1], [0, 0, 1, 1], [], []>} : vector<8x128xf32>, vector<128x128xf32>, vector<8x128xf32> -> vector<8x128xf32>
    %15 = arith.addf %10, %14 : vector<8x128xf32>
    %16 = vector.extract_strided_slice %6 {offsets = [16, 0], sizes = [8, 128], strides = [1, 1]} : vector<24x128xf32> to vector<8x128xf32>
    %c0_13 = arith.constant 0 : index
    %c256 = arith.constant 256 : index
    %c0_14 = arith.constant 0 : index
    %17 = vector.load %arg5[%c0_13, %c256, %c0_14] : memref<1x384x128xf32, #tpu.memory_space<vmem>>, vector<1x128x128xf32>
    %18 = vector.shape_cast %17 : vector<1x128x128xf32> to vector<128x128xf32>
    %cst_15 = arith.constant dense<0.000000e+00> : vector<8x128xf32>
    %19 = tpu.matmul %16, %18, %cst_15 {dimension_numbers = #tpu.dot_dimension_numbers<[1], [0], [0], [1], [0, 0, 1, 1], [], []>} : vector<8x128xf32>, vector<128x128xf32>, vector<8x128xf32> -> vector<8x128xf32>
    %20 = arith.addf %15, %19 : vector<8x128xf32>
    %c0_16 = arith.constant 0 : index
    %c0_17 = arith.constant 0 : index
    %c0_18 = arith.constant 0 : index
    %21 = vector.load %arg6[%c0_16, %c0_17, %c0_18] : memref<1x8x256xf32, #tpu.memory_space<vmem>>, vector<1x8x128xf32>
    %22 = vector.shape_cast %21 : vector<1x8x128xf32> to vector<8x128xf32>
    %23 = vector.shape_cast %20 : vector<8x128xf32> to vector<1x8x128xf32>
    tpu.vector_store %arg6[%c0_16, %c0_17, %c0_18], %23 {strides = array<i32>} : memref<1x8x256xf32, #tpu.memory_space<vmem>>, vector<1x8x128xf32>,
    %c0_19 = arith.constant 0 : index
    %c0_20 = arith.constant 0 : index
    %c128_21 = arith.constant 128 : index
    %24 = vector.load %arg2[%c0_19, %c0_20, %c128_21] : memref<1x4x256xf32, #tpu.memory_space<vmem>>, vector<1x4x128xf32>
    %25 = vector.shape_cast %24 : vector<1x4x128xf32> to vector<4x128xf32>
    %c0_22 = arith.constant 0 : index
    %c0_23 = arith.constant 0 : index
    %26 = vector.load %arg3[%c0_22, %c0_23] : memref<24x4xf32, #tpu.memory_space<vmem>>, vector<24x4xf32>
    %cst_24 = arith.constant dense<0.000000e+00> : vector<24x128xf32>
    %27 = tpu.matmul %26, %25, %cst_24 {dimension_numbers = #tpu.dot_dimension_numbers<[1], [0], [0], [1], [0, 0, 1, 1], [], []>} : vector<24x4xf32>, vector<4x128xf32>, vector<24x128xf32> -> vector<24x128xf32>
    %28 = vector.broadcast %0 : vector<24x1xf32> to vector<24x128xf32>
    %29 = arith.addf %27, %28 : vector<24x128xf32>
    %30 = vector.extract_strided_slice %29 {offsets = [0, 0], sizes = [8, 128], strides = [1, 1]} : vector<24x128xf32> to vector<8x128xf32>
    %c0_25 = arith.constant 0 : index
    %c0_26 = arith.constant 0 : index
    %c0_27 = arith.constant 0 : index
    %31 = vector.load %arg5[%c0_25, %c0_26, %c0_27] : memref<1x384x128xf32, #tpu.memory_space<vmem>>, vector<1x128x128xf32>
    %32 = vector.shape_cast %31 : vector<1x128x128xf32> to vector<128x128xf32>
    %cst_28 = arith.constant dense<0.000000e+00> : vector<8x128xf32>
    %33 = tpu.matmul %30, %32, %cst_28 {dimension_numbers = #tpu.dot_dimension_numbers<[1], [0], [0], [1], [0, 0, 1, 1], [], []>} : vector<8x128xf32>, vector<128x128xf32>, vector<8x128xf32> -> vector<8x128xf32>
    %34 = vector.extract_strided_slice %29 {offsets = [8, 0], sizes = [8, 128], strides = [1, 1]} : vector<24x128xf32> to vector<8x128xf32>
    %c0_29 = arith.constant 0 : index
    %c128_30 = arith.constant 128 : index
    %c0_31 = arith.constant 0 : index
    %35 = vector.load %arg5[%c0_29, %c128_30, %c0_31] : memref<1x384x128xf32, #tpu.memory_space<vmem>>, vector<1x128x128xf32>
    %36 = vector.shape_cast %35 : vector<1x128x128xf32> to vector<128x128xf32>
    %cst_32 = arith.constant dense<0.000000e+00> : vector<8x128xf32>
    %37 = tpu.matmul %34, %36, %cst_32 {dimension_numbers = #tpu.dot_dimension_numbers<[1], [0], [0], [1], [0, 0, 1, 1], [], []>} : vector<8x128xf32>, vector<128x128xf32>, vector<8x128xf32> -> vector<8x128xf32>
    %38 = arith.addf %33, %37 : vector<8x128xf32>
    %39 = vector.extract_strided_slice %29 {offsets = [16, 0], sizes = [8, 128], strides = [1, 1]} : vector<24x128xf32> to vector<8x128xf32>
    %c0_33 = arith.constant 0 : index
    %c256_34 = arith.constant 256 : index
    %c0_35 = arith.constant 0 : index
    %40 = vector.load %arg5[%c0_33, %c256_34, %c0_35] : memref<1x384x128xf32, #tpu.memory_space<vmem>>, vector<1x128x128xf32>
    %41 = vector.shape_cast %40 : vector<1x128x128xf32> to vector<128x128xf32>
    %cst_36 = arith.constant dense<0.000000e+00> : vector<8x128xf32>
    %42 = tpu.matmul %39, %41, %cst_36 {dimension_numbers = #tpu.dot_dimension_numbers<[1], [0], [0], [1], [0, 0, 1, 1], [], []>} : vector<8x128xf32>, vector<128x128xf32>, vector<8x128xf32> -> vector<8x128xf32>
    %43 = arith.addf %38, %42 : vector<8x128xf32>
    %c0_37 = arith.constant 0 : index
    %c0_38 = arith.constant 0 : index
    %c128_39 = arith.constant 128 : index
    %44 = vector.load %arg6[%c0_37, %c0_38, %c128_39] : memref<1x8x256xf32, #tpu.memory_space<vmem>>, vector<1x8x128xf32>
    %45 = vector.shape_cast %44 : vector<1x8x128xf32> to vector<8x128xf32>
    %46 = vector.shape_cast %43 : vector<8x128xf32> to vector<1x8x128xf32>
    tpu.vector_store %arg6[%c0_37, %c0_38, %c128_39], %46 {strides = array<i32>} : memref<1x8x256xf32, #tpu.memory_space<vmem>>, vector<1x8x128xf32>,
    return
  }
  func.func @transform_0(%arg0: i32, %arg1: i32) -> (i32, i32, i32) {
    %c0_i32 = arith.constant 0 : i32
    %c0_i32_0 = arith.constant 0 : i32
    return %arg0, %c0_i32, %arg1 : i32, i32, i32
  }
  func.func @transform_1(%arg0: i32, %arg1: i32) -> (i32, i32) {
    %c0_i32 = arith.constant 0 : i32
    %c0_i32_0 = arith.constant 0 : i32
    %c0_i32_1 = arith.constant 0 : i32
    return %c0_i32, %c0_i32_0 : i32, i32
  }
  func.func @transform_2(%arg0: i32, %arg1: i32) -> (i32, i32) {
    %c0_i32 = arith.constant 0 : i32
    %c0_i32_0 = arith.constant 0 : i32
    %c0_i32_1 = arith.constant 0 : i32
    return %c0_i32, %c0_i32_0 : i32, i32
  }
  func.func @transform_3(%arg0: i32, %arg1: i32) -> (i32, i32, i32) {
    %c0_i32 = arith.constant 0 : i32
    %c0_i32_0 = arith.constant 0 : i32
    %c0_i32_1 = arith.constant 0 : i32
    return %arg0, %c0_i32, %c0_i32_0 : i32, i32, i32
  }
  func.func @transform_4(%arg0: i32, %arg1: i32) -> (i32, i32, i32) {
    %c0_i32 = arith.constant 0 : i32
    %c0_i32_0 = arith.constant 0 : i32
    return %arg0, %c0_i32, %arg1 : i32, i32, i32
  }
}

</mosaic_0001>

<bundles_post_ra>
// kernel: tpu_custom_call.1
= control target key start
LH: loop header
LB: loop body
LE: loop exit
PB: predicated region body
PF: predicated region fallthrough
CT: control target
= control target key end

     0   :  { %9 = vsyncpa [#allocation3], 0  ;;  %s2397_s0 = inlined_call_operand.vmem [shape: f32[2,4,512], index: 0, kind: input, shape index: {}]   ;;  %s2398_s1 = inlined_call_operand.vmem [shape: f32[24,4], index: 1, kind: input, shape index: {}]   ;;  %s2399_s2 = inlined_call_operand.vmem [shape: f32[24,1], index: 2, kind: input, shape index: {}]   ;;  %s2400_s3 = inlined_call_operand.hbm [shape: f32[2,384,128], index: 3, kind: input, shape index: {}]   ;;  %s2401_s4 = inlined_call_operand.hbm [shape: f32[2,8,512], index: 4, kind: output, shape index: {}]  }
   0x1   :  { %11 = vsyncpa [#allocation3 + $0x1], 0 }
   0x2   :  { %12 = vsyncpa [#allocation4], 0 }
   0x3   :  { %14 = vsyncpa [#allocation4 + $0x1], 0  ;;  %s1778_s15 = smov 0   ;;  %s1780_s16 = smov 0  }
   0x4   :  { %s1782_s17 = smov 0   ;;  %s1784_s18 = smov 0  }
   0x5   :  { %s1786_s19 = smov 0   ;;  %s1788_s20 = smov 0  }
   0x6   :  { %s1790_s21 = smov 0   ;;  %s1792_s22 = smov 0  }
   0x7   :  { %s1794_s23 = smov 0   ;;  %s1796_s24 = smov 0  }
   0x8   :  { %s1798_s25 = smov 0  }
   0x9 LB: > { %2406 = sst [smem:[#allocation8_spill]] %s1736_s23  ;;  %s1118_s26 = sadd.s32 4294967295, %s1744_s25   ;;  %s1744_s25 = sphi %s1798_s25, %s20_s25   ;;  %s1740_s24 = sphi %s1796_s24, %s2420_s24   ;;  %s1736_s23 = sphi %s1794_s23, %s2419_s23   ;;  %s1732_s22 = sphi %s1792_s22, %s2418_s22   ;;  %s1728_s21 = sphi %s1790_s21, %s2417_s21   ;;  %s1724_s20 = sphi %s1788_s20, %s2426_s20   ;;  %s1720_s19 = sphi %s1786_s19, %s2425_s19   ;;  %s1716_s18 = sphi %s1784_s18, %s2424_s18   ;;  %s1712_s17 = sphi %s1782_s17, %s2423_s17   ;;  %s1708_s16 = sphi %s1780_s16, %s2422_s16   ;;  %s1704_s15 = sphi %s1778_s15, %s2421_s15  }
   0xa   : > { %2407 = sst [smem:[#allocation9_spill]] %s1740_s24  ;;  %s1119_s27 = sadd.s32 4294967294, %s1744_s25  }
   0xb   : > { %s29_s28 = sadd.s32 1, %s1736_s23  ;;  %s32_s29 = sadd.s32 1, %s1740_s24 }
   0xc   : > { %p30_p0 = scmp.ge.s32.totalorder %s29_s28, 2  ;;  %s109_s30 = sadd.s32 1, %s1724_s20 }
   0xd   : > { %p116_p1 = scmp.ne.s32.totalorder %s1724_s20, %s1720_s19  ;;  %p117_p2 = scmp.eq.s32.totalorder %s1744_s25, 0 }
   0xe   : > { %s2428_s28 = smov (%p30_p0, %s29_s28), 0  ;;  %s2430_s29 = smov (!%p30_p0, %s32_s29), %s1740_s24 }
   0xf   : > { %2408 = sst [smem:[#allocation10_spill]] %s2428_s28  ;;  %p1842_p3 = por %p117_p2, %p116_p1 }
  0x10   : > { %p122_p4 = scmp.ne.s32.totalorder %s1720_s19, %s1716_s18  ;;  %p34_p5 = scmp.ge.s32.totalorder %s2430_s29, 2 }
  0x11   : > { %p123_p6 = scmp.eq.s32.totalorder %s1118_s26, 0  ;;  %s133_s6 = ssub.s32 %s1736_s23, %s2428_s28 }
  0x12   : > { %s137_s7 = sadd.s32 1, %s1712_s17  ;;  %s2432_s29 = smov (%p34_p5, %s2430_s29), 0 }
  0x13   : > { %2410 = sst [smem:[#allocation11_spill]] %s2432_s29  ;;  %p1852_p7 = por %p123_p6, %p122_p4 }
  0x14   : > { %p147_p8 = scmp.ne.s32.totalorder %s1712_s17, %s1708_s16  ;;  %s106_s9 = ssub.s32 %s1740_s24, %s2432_s29 }
  0x15   : > { %p148_p9 = scmp.eq.s32.totalorder %s1118_s26, 3  ;;  %p107_p10 = scmp.eq.s32.totalorder %s106_s9, 0 }
  0x16   : > { %s134_s10 = sor.u32 %s133_s6, %s106_s9  ;;  %p153_p13 = scmp.ne.s32.totalorder %s1708_s16, %s1704_s15 }
  0x17   : > { %p135_p11 = scmp.eq.s32.totalorder %s134_s10, 0  ;;  %p1860_p12 = por %p148_p9, %p147_p8 }
  0x18   : > { %s1865_s12 = scalar_select %p107_p10, %s1724_s20, %s109_s30  }
  0x19   : > { %s1868_s13 = scalar_select %p135_p11, %s1712_s17, %s137_s7  }
  0x1a   : > { %2413 = sst [smem:[#allocation12_spill]] %s1865_s12  ;;  %p154_p0 = scmp.eq.s32.totalorder %s1119_s27, 3 }
  0x1b   : > { %p1499_p1 = scmp.lt.s32.totalorder %s1744_s25, 4  ;;  %s193_s18 = sand.u32 1, %s1724_s20  }
  0x1c   : > { %p1873_p2 = por %p154_p0, %p153_p13  ;;  %s1484_s26 = smul.u32 384, %s193_s18 }
  0x1d   : > { %s1485_s6 = smul.u32 6144, %s1740_s24  ;;  %p1881_p4 = pnand %p1499_p1, %p1842_p3 }
  0x1e   : > { %s197_s29 = scalar_lea.vmem [#allocation2], %s1484_s26  ;;  %p1123_p5 = scmp.ge.s32.totalorder %s1744_s25, 1 }
  0x1f   : > { %s203_s7 = scalar_lea.hbm %s2400_s3, %s1485_s6  ;;  %s204_s27 = sshll.u32 %s197_s29, 4  ;;  %s205_s27 = int_to_ptr.vmem [resolvable:$true] %s204_s27 }
  0x20   : > { %s194_s28 = scalar_lea.sflag [#allocation3], %s193_s18  ;;  %p1598_p6 = pneg %p1881_p4 }
  0x21   : > { %s1609_s23 = scalar_lea.vmem %s205_s27, 6144  ;;  %s1746_s5 = smov [#allocation2]  }
  0x22   : > { %p1610_p8 = scmp.ne.s32.totalorder %s205_s27, %s1609_s23  ;;  %s1614_s24 = sshll.u32 %s1746_s5, 4  ;;  %s1615_s24 = int_to_ptr.vmem [resolvable:$false] %s1614_s24 }
  0x23   : > { %s1616_s12 = scalar_lea.vmem %s1615_s24, 12288  ;;  %p1617_p3 = scmp.lt.s32.totalorder %s205_s27, %s1615_s24 }
  0x24   : > { %p1612_p9 = pnand %p1610_p8, %p1598_p6  ;;  %p1618_p11 = scmp.lt.s32.totalorder %s1616_s12, %s1609_s23 }
  0x26   : > { %p1613_p10 = pneg %p1612_p9  ;;  %p1619_p13 = por %p1618_p11, %p1617_p3 }
  0x28   : > { %p1620_p0 = pnand %p1619_p13, %p1613_p10 }
  0x2a   : > { %1623 = shalt.err (!%p1620_p0)
}
  0x2b   : > { %s1747_s26 = smov 128   ;;  %s1748_s29 = smov 8  }
  0x2c   : > { %1494 = dma.hbm_to_vmem [thread:$0]  (!%p1881_p4), %s203_s7, 6144, %s205_s27, %s194_s28, %s1747_s26, %s1747_s26, %s1748_s29  }
  0x2d   : > { %p212_p1 = scmp.lt.s32.totalorder %s1744_s25, 5 }
  0x2f   : > { %p213_p6 = pnand %p1123_p5, %p212_p1 }
  0x30   : > { %s218_s18 = sand.u32 (!%p213_p6), 1, %s1720_s19  }
  0x31   : > { %216 = sbr.rel (%p213_p6) target bundleno = 703 (0x2bf), region = 36  ;;  %s219_s24 = scalar_lea.sflag (!%p213_p6), [#allocation3], %s218_s18 }
  0x32   : > { %s1486_s6 = smul.u32 (!%p213_p6), 384, %s218_s18 }
  0x34   : > { %s1897_s23 = scalar_lea.vmem (!%p213_p6), [#allocation2], %s1486_s6 }
  0x36   : > { %1695 = dma.done.wait (%p1852_p7), %s219_s24, 6144  }
  0x37   : > { %1697 = vsyncadd (%p1852_p7), %s219_s24, 4294961152  ;;  %s1904_s28 = sshll.u32 %s1728_s21, 1  ;;  %p257_p4 = scmp.lt.s32.totalorder %s1732_s22, 1  ;;  %v1749_v0 = vmov 0.0   ;;  %vm1750_vm0 = vmmov 0   ;;  %v1751_v1 = vmov 0  }
  0x38   : > { %1252 = vmatprep.subr.mxu1 %v1749_v0  ;;  %p259_p5 = scmp.lt.s32.totalorder %s1904_s28, 3  ;;  %1254 = vmatprep.mubr.msk.f32.mxu1 %vm1750_vm0, %v1749_v0  ;;  %vm299_vm1 = vcmask 1043456   ;;  %v1924_v2 = vld [vmem:[%s2398_s1] sm:$0xff]  ;;  %vm289_vm2 = vcmask 31744   ;;  %v269_v5 = vld [vmem:[%s2399_s2 + $0x10] sm:$0xff]  ;;  %v1935_v6 = vld [vmem:[%s1897_s23 + $0x78] sm:$0xff] }
  0x39   : > { %s258_s12 = scalar_select %p257_p4, %s1732_s22, 1  ;;  %1594 = vset.pattern.permute.xlu0 %v1751_v1  ;;  %1595 = vset.pattern.permute.xlu1 %v1751_v1  ;;  %v267_v4 = vld [vmem:[%s2399_s2] sm:$0xff]  ;;  %v268_v7 = vld [vmem:[%s2399_s2 + $0x8] sm:$0xff]  ;;  %v1943_v8 = vld [vmem:[%s1897_s23 + $0x70] sm:$0xff] }
  0x3a   : > { %s260_s8 = scalar_select %p259_p5, %s1904_s28, 3  ;;  %1298 = vmatprep.subr.mxu0 %v1749_v0  ;;  %1330 = vmatprep.mubr.msk.f32.mxu0 %vm1750_vm0, %v1749_v0  ;;  %v1950_v9 = vld [vmem:[%s2398_s1 + $0x8] sm:$0xff]  ;;  %v1956_v10 = vld [vmem:[%s1897_s23 + $0xf8] sm:$0xff]  ;;  %v1966_v12 = vld [vmem:[%s1897_s23 + $0xf0] sm:$0xff] }
  0x3b   : > { %s1126_s21 = sshll.u32 %s258_s12, 2  ;;  %276 = vperm.xlu0 %1594, %v267_v4   ;;  %286 = vperm.xlu1 %1595, %v269_v5   ;;  %v1960_v11 = vld [vmem:[%s1897_s23 + $0x68] sm:$0xff]  ;;  %v1973_v13 = vld [vmem:[%s2398_s1 + $0x10] sm:$0xff]  ;;  %v1977_v14 = vld [vmem:[%s1897_s23 + $0x60] sm:$0xff]  ;;  %s1138_s5 = sshll.u32 %s1732_s22, 2 }
  0x3c   : > { %s262_s9 = sadd.s32 %s1126_s21, %s260_s8  ;;  %1299 = vmatpush3.msra.mxu0 %v1935_v6  ;;  %v1984_v15 = vld [vmem:[%s1897_s23 + $0xe8] sm:$0xff]  ;;  %v1987_v16 = vld [vmem:[%s1897_s23 + $0x58] sm:$0xff]  ;;  %v1995_v17 = vld [vmem:[%s1897_s23 + $0xe0] sm:$0xff]  ;;  %s1012_s26 = sadd.s32 %s1138_s5, %s1904_s28 }
  0x3d   : > { %s1127_s10 = sshll.u32 %s262_s9, 2  ;;  %1300 = vmatprep.subr.mxu0 %v1749_v0  ;;  %v1998_v18 = vld [vmem:[%s1897_s23 + $0x50] sm:$0xff]  ;;  %v2005_v19 = vld [vmem:[%s1897_s23 + $0xd8] sm:$0xff]  ;;  %v2008_v20 = vld [vmem:[%s1897_s23 + $0x48] sm:$0xff]  ;;  %s1139_s29 = sshll.u32 %s1012_s26, 7 }
  0x3e   : > { %s1919_s27 = scalar_lea.vmem %s2397_s0, %s1127_s10  ;;  %1301 = vmatpush3.msra.mxu0 %v1943_v8  ;;  %v2015_v21 = vld [vmem:[%s1897_s23 + $0xd0] sm:$0xff]  ;;  %v2018_v22 = vld [vmem:[%s1897_s23 + $0x40] sm:$0xff]  ;;  %v2025_v23 = vld [vmem:[%s1897_s23 + $0xc8] sm:$0xff]  ;;  %s2340_s12 = scalar_lea.hbm %s2401_s4, %s1139_s29 }
  0x3f   : > { %v270_v3 = vld [vmem:[%s1919_s27] sm:$0xf]  ;;  %281 = vperm.xlu0 %1594, %v268_v7   ;;  %1302 = vmatprep.subr.mxu0 %v1749_v0  ;;  %v2028_v24 = vld [vmem:[%s1897_s23 + $0x38] sm:$0xff]  ;;  %v2038_v26 = vld [vmem:[%s1897_s23 + $0x30] sm:$0xff]  ;;  %s1752_s22 = smov [#allocation5]  }
  0x40   : > { %1253 = vmatpush3.msk.msra.mxu1 %vm299_vm1, %v270_v3  ;;  %1303 = vmatpush3.msra.mxu0 %v1960_v11  ;;  %v2035_v25 = vld [vmem:[%s1897_s23 + $0xc0] sm:$0xff]  ;;  %v2045_v27 = vld [vmem:[%s1897_s23 + $0xb8] sm:$0xff]  ;;  %v2048_v28 = vld [vmem:[%s1897_s23 + $0x28] sm:$0xff]  ;;  %s1628_s28 = sshll.u32 %s1752_s22, 4  ;;  %s1629_s28 = int_to_ptr.vmem [resolvable:$false] %s1628_s28 }
  0x41   : > { %1255 = vmatmul.mubr.msk.f32.vlgmr.msra.gmra.mxu1 %vm289_vm2, %v1924_v2  ;;  %1263 = vmatprep.subr.mxu1 %v1749_v0  ;;  %v2055_v29 = vld [vmem:[%s1897_s23 + $0xb0] sm:$0xff]  ;;  %v2058_v30 = vld [vmem:[%s1897_s23 + $0x20] sm:$0xff]  ;;  %v2065_v31 = vld [vmem:[%s1897_s23 + $0xa8] sm:$0xff]  ;;  %s1630_s9 = scalar_lea.vmem %s1629_s28, 512 }
  0x42   : > { %1257 = vmatprep.mubr.msk.f32.mxu1 %vm1750_vm0, %v1749_v0  ;;  %1264 = vmatpush3.msra.mxu1 %v1956_v10  ;;  %v2068_v32 = vld [vmem:[%s1897_s23 + $0x18] sm:$0xff]  ;;  %v2075_v33 = vld [vmem:[%s1897_s23 + $0xa0] sm:$0xff]  ;;  %v2078_v34 = vld [vmem:[%s1897_s23 + $0x10] sm:$0xff] }
  0x43   : > { %1265 = vmatprep.subr.mxu1 %v1749_v0  ;;  %1304 = vmatprep.subr.mxu0 %v1749_v0  ;;  %v2085_v35 = vld [vmem:[%s1897_s23 + $0x98] sm:$0xff]  ;;  %v2088_v36 = vld [vmem:[%s1897_s23 + $0x8] sm:$0xff]  ;;  %v2101_v37 = vld [vmem:[%s1897_s23 + $0x90] sm:$0xff] }
  0x44   : > { %1266 = vmatpush3.msra.mxu1 %v1966_v12  ;;  %1305 = vmatpush3.msra.mxu0 %v1977_v14  ;;  %v2105_v38 = vld [vmem:[%s1897_s23] sm:$0xff]  ;;  %v2110_v39 = vld [vmem:[%s1897_s23 + $0x88] sm:$0xff]  ;;  %v2131_v49 = vld [vmem:[%s1897_s23 + $0x178] sm:$0xff] }
  0x45   : > { %1258 = vmatmul.mubr.msk.f32.gmra.mxu1 %vm289_vm2, %v1950_v9  ;;  %1267 = vmatprep.subr.mxu1 %v1749_v0  ;;  %v2116_v40 = vld [vmem:[%s1897_s23 + $0x80] sm:$0xff]  ;;  %v2137_v51 = vld [vmem:[%s1897_s23 + $0x170] sm:$0xff]  ;;  %v2146_v53 = vld [vmem:[%s1897_s23 + $0x168] sm:$0xff] }
  0x46   : > { %1260 = vmatprep.mubr.msk.f32.mxu1 %vm1750_vm0, %v1749_v0  ;;  %1306 = vmatprep.subr.mxu0 %v1749_v0  ;;  %v643_v43 = vld [vmem:[%s1919_s27 + $0x4] sm:$0xf]  ;;  %v2163_v56 = vld [vmem:[%s1897_s23 + $0x158] sm:$0xff]  ;;  %v2172_v57 = vld [vmem:[%s1897_s23 + $0x150] sm:$0xff] }
  0x47   : > { %1268 = vmatpush3.msra.mxu1 %v1984_v15  ;;  %1307 = vmatpush3.msra.mxu0 %v1987_v16  ;;  %v2156_v55 = vld [vmem:[%s1897_s23 + $0x160] sm:$0xff]  ;;  %v2178_v58 = vld [vmem:[%s1897_s23 + $0x148] sm:$0xff]  ;;  %v2192_v60 = vld [vmem:[%s1897_s23 + $0x138] sm:$0xff] }
  0x48   : > { %1269 = vmatprep.subr.mxu1 %v1749_v0  ;;  %1308 = vmatprep.subr.mxu0 %v1749_v0  ;;  %v2185_v59 = vld [vmem:[%s1897_s23 + $0x140] sm:$0xff]  ;;  %v2199_v61 = vld [vmem:[%s1897_s23 + $0x130] sm:$0xff]  ;;  %v2206_v62 = vld [vmem:[%s1897_s23 + $0x128] sm:$0xff] }
  0x49   : > { %1261 = vmatmul.mubr.msk.f32.gmra.mxu1 %vm289_vm2, %v1973_v13  ;;  %1309 = vmatpush3.msra.mxu0 %v1998_v18  ;;  %v2213_v63 = vld [vmem:[%s1897_s23 + $0x120] sm:$0xff]  ;;  %v2220_v1 = vld [vmem:[%s1897_s23 + $0x118] sm:$0xff]  ;;  %v2236_v4 = vld [vmem:[%s1897_s23 + $0x108] sm:$0xff] }
  0x4a   : > { %1270 = vmatpush3.msra.mxu1 %v1995_v17  ;;  %1310 = vmatprep.subr.mxu0 %v1749_v0  ;;  %v2245_v7 = vld [vmem:[%s1897_s23 + $0x100] sm:$0xff] }
  0x4b   : > { %1271 = vmatprep.subr.mxu1 %v1749_v0  ;;  %1311 = vmatpush3.msra.mxu0 %v2008_v20 }
  0x4c   : > { %1272 = vmatpush3.msra.mxu1 %v2005_v19  ;;  %1312 = vmatprep.subr.mxu0 %v1749_v0 }
  0x4d   : > { %1273 = vmatprep.subr.mxu1 %v1749_v0  ;;  %1313 = vmatpush3.msra.mxu0 %v2018_v22 }
  0x4e   : > { %1274 = vmatpush3.msra.mxu1 %v2015_v21  ;;  %1314 = vmatprep.subr.mxu0 %v1749_v0 }
  0x4f   : > { %1275 = vmatprep.subr.mxu1 %v1749_v0  ;;  %1315 = vmatpush3.msra.mxu0 %v2028_v24 }
  0x50   : > { %1276 = vmatpush3.msra.mxu1 %v2025_v23  ;;  %1316 = vmatprep.subr.mxu0 %v1749_v0 }
  0x51   : > { %1277 = vmatprep.subr.mxu1 %v1749_v0  ;;  %1317 = vmatpush3.msra.mxu0 %v2038_v26 }
  0x52   : > { %1278 = vmatpush3.msra.mxu1 %v2035_v25  ;;  %1318 = vmatprep.subr.mxu0 %v1749_v0 }
  0x53   : > { %1279 = vmatprep.subr.mxu1 %v1749_v0  ;;  %1319 = vmatpush3.msra.mxu0 %v2048_v28 }
  0x54   : > { %1280 = vmatpush3.msra.mxu1 %v2045_v27  ;;  %1320 = vmatprep.subr.mxu0 %v1749_v0 }
  0x55   : > { %1281 = vmatprep.subr.mxu1 %v1749_v0  ;;  %1321 = vmatpush3.msra.mxu0 %v2058_v30 }
  0x56   : > { %1282 = vmatpush3.msra.mxu1 %v2055_v29  ;;  %1322 = vmatprep.subr.mxu0 %v1749_v0 }
  0x57   : > { %1283 = vmatprep.subr.mxu1 %v1749_v0  ;;  %1323 = vmatpush3.msra.mxu0 %v2068_v32 }
  0x58   : > { %1284 = vmatpush3.msra.mxu1 %v2065_v31  ;;  %1324 = vmatprep.subr.mxu0 %v1749_v0 }
  0x59   : > { %1285 = vmatprep.subr.mxu1 %v1749_v0  ;;  %1325 = vmatpush3.msra.mxu0 %v2078_v34 }
  0x5a   : > { %1286 = vmatpush3.msra.mxu1 %v2075_v33  ;;  %1326 = vmatprep.subr.mxu0 %v1749_v0 }
  0x5b   : > { %1287 = vmatprep.subr.mxu1 %v1749_v0  ;;  %1327 = vmatpush3.msra.mxu0 %v2088_v36 }
  0x5c   : > { %1288 = vmatpush3.msra.mxu1 %v2085_v35  ;;  %1328 = vmatprep.subr.mxu0 %v1749_v0 }
  0x5d   : > { %1289 = vmatprep.subr.mxu1 %v1749_v0  ;;  %1295 = vmatprep.mubr.msk.f32.mxu1 %vm1750_vm0, %v1749_v0 }
  0x5e   : > { %1290 = vmatpush3.msra.mxu1 %v2101_v37  ;;  %1329 = vmatpush3.msra.mxu0 %v2105_v38 }
  0x5f   : > { %1291 = vmatprep.subr.mxu1 %v1749_v0  ;;  %1368 = vmatprep.subr.mxu0 %v1749_v0 }
  0x60   : > { %1292 = vmatpush3.msra.mxu1 %v2110_v39 }
  0x61   : > { %1293 = vmatprep.subr.mxu1 %v1749_v0 }
  0x62   : > { %1294 = vmatpush3.msra.mxu1 %v2116_v40 }
  0x63   : > { %1333 = vmatprep.subr.mxu1 %v1749_v0 }
  0xb6   : > { %v2120_v41 = vpop.permute.xlu0 %276  ;;  %v2231_v3 = vpop.permute.xlu1 %286 }
  0xba   : > { %v2124_v46 = vpop.permute.xlu0 %281 }
 0x101   : > { %v369_v42 = vpop.f32.mrf.mxu1 }
 0x102   : > { %v370_v44 = vadd.f32 %v369_v42, %v2120_v41 }
 0x103   : > { %v1256_v45 = vpop.f32.mrf.mxu1 }
 0x104   : > { %1331 = vmatmul.mubr.f32.vlgmr.msra.gmra.mxu0 %v370_v44 }
 0x105   : > { %1369 = vmatpush3.msk.msra.mxu0 %vm299_vm1, %v643_v43  ;;  %v374_v47 = vpop.f32.mrf.mxu1  ;;  %1370 = vmatprep.mubr.msk.f32.mxu0 %vm1750_vm0, %v1749_v0 }
 0x106   : > { %v375_v48 = vadd.f32 %v374_v47, %v2124_v46  ;;  %1379 = vmatprep.subr.mxu0 %v1749_v0 }
 0x107   : > { %v1259_v50 = vpop.f32.mrf.mxu1 }
 0x108   : > { %1296 = vmatmul.mubr.f32.vlgmr.msra.gmra.mxu1 %v375_v48  ;;  %1371 = vmatmul.mubr.msk.f32.vlgmr.msra.gmra.mxu0 %vm289_vm2, %v1924_v2  ;;  %v2227_v2 = vld [vmem:[%s1897_s23 + $0x110] sm:$0xff]  ;;  %s253_s23 = sand.u32 1, %s1708_s16  }
 0x109   : > { %1334 = vmatpush3.msra.mxu1 %v2131_v49  ;;  %1373 = vmatprep.mubr.msk.f32.mxu0 %vm1750_vm0, %v1749_v0  ;;  %v2142_v52 = vpop.f32.mrf.mxu1  ;;  %s1124_s7 = sshll.u32 %s253_s23, 4  ;;  %s1000_s8 = scalar_lea.sflag [#allocation4], %s253_s23 }
 0x10a   : > { %1335 = vmatprep.subr.mxu1 %v1749_v0  ;;  %1365 = vmatprep.mubr.msk.f32.mxu1 %vm1750_vm0, %v1749_v0  ;;  %v380_v5 = vadd.f32 %v2142_v52, %v2231_v3  ;;  %s255_s27 = scalar_lea.vmem [#allocation5], %s1124_s7 }
 0x10b   : > { %1336 = vmatpush3.msra.mxu1 %v2137_v51  ;;  %1380 = vmatpush3.msra.mxu0 %v1956_v10  ;;  %v1262_v54 = vpop.f32.mrf.mxu1  ;;  %s1016_s18 = sshll.u32 %s255_s27, 4  ;;  %s1017_s18 = int_to_ptr.vmem [resolvable:$true] %s1016_s18 }
 0x10c   : > { %1337 = vmatprep.subr.mxu1 %v1749_v0  ;;  %1374 = vmatmul.mubr.msk.f32.gmra.mxu0 %vm289_vm2, %v1950_v9  ;;  %s1624_s21 = scalar_lea.vmem %s1017_s18, 256  ;;  %p1631_p10 = scmp.lt.s32.totalorder %s1017_s18, %s1629_s28 }
 0x10d   : > { %1338 = vmatpush3.msra.mxu1 %v2146_v53  ;;  %1376 = vmatprep.mubr.msk.f32.mxu0 %vm1750_vm0, %v1749_v0  ;;  %p1625_p7 = scmp.ne.s32.totalorder %s1017_s18, %s1624_s21  ;;  %p1632_p3 = scmp.lt.s32.totalorder %s1630_s9, %s1624_s21 }
 0x10e   : > { %1339 = vmatprep.subr.mxu1 %v1749_v0  ;;  %1381 = vmatprep.subr.mxu0 %v1749_v0 }
 0x10f   : > { %1340 = vmatpush3.msra.mxu1 %v2156_v55  ;;  %1382 = vmatpush3.msra.mxu0 %v1966_v12  ;;  %p1626_p8 = pnand %p1625_p7, %p1860_p12  ;;  %p1633_p11 = por %p1632_p3, %p1631_p10 }
 0x110   : > { %1341 = vmatprep.subr.mxu1 %v1749_v0  ;;  %1377 = vmatmul.mubr.msk.f32.gmra.mxu0 %vm289_vm2, %v1973_v13 }
 0x111   : > { %1342 = vmatpush3.msra.mxu1 %v2163_v56  ;;  %1383 = vmatprep.subr.mxu0 %v1749_v0  ;;  %p1627_p9 = pneg %p1626_p8 }
 0x112   : > { %1343 = vmatprep.subr.mxu1 %v1749_v0  ;;  %1384 = vmatpush3.msra.mxu0 %v1984_v15 }
 0x113   : > { %1344 = vmatpush3.msra.mxu1 %v2172_v57  ;;  %1385 = vmatprep.subr.mxu0 %v1749_v0  ;;  %p1634_p13 = pnand %p1633_p11, %p1627_p9 }
 0x114   : > { %1345 = vmatprep.subr.mxu1 %v1749_v0  ;;  %1386 = vmatpush3.msra.mxu0 %v1995_v17 }
 0x115   : > { %1346 = vmatpush3.msra.mxu1 %v2178_v58  ;;  %1387 = vmatprep.subr.mxu0 %v1749_v0 }
 0x116   : > { %1347 = vmatprep.subr.mxu1 %v1749_v0  ;;  %1388 = vmatpush3.msra.mxu0 %v2005_v19 }
 0x117   : > { %1348 = vmatpush3.msra.mxu1 %v2185_v59  ;;  %1389 = vmatprep.subr.mxu0 %v1749_v0 }
 0x118   : > { %1349 = vmatprep.subr.mxu1 %v1749_v0  ;;  %1390 = vmatpush3.msra.mxu0 %v2015_v21 }
 0x119   : > { %1350 = vmatpush3.msra.mxu1 %v2192_v60  ;;  %1391 = vmatprep.subr.mxu0 %v1749_v0 }
 0x11a   : > { %1351 = vmatprep.subr.mxu1 %v1749_v0  ;;  %1392 = vmatpush3.msra.mxu0 %v2025_v23 }
 0x11b   : > { %1352 = vmatpush3.msra.mxu1 %v2199_v61  ;;  %1393 = vmatprep.subr.mxu0 %v1749_v0 }
 0x11c   : > { %1353 = vmatprep.subr.mxu1 %v1749_v0  ;;  %1394 = vmatpush3.msra.mxu0 %v2035_v25 }
 0x11d   : > { %1354 = vmatpush3.msra.mxu1 %v2206_v62  ;;  %1395 = vmatprep.subr.mxu0 %v1749_v0 }
 0x11e   : > { %1355 = vmatprep.subr.mxu1 %v1749_v0  ;;  %1396 = vmatpush3.msra.mxu0 %v2045_v27 }
 0x11f   : > { %1356 = vmatpush3.msra.mxu1 %v2213_v63  ;;  %1397 = vmatprep.subr.mxu0 %v1749_v0 }
 0x120   : > { %1357 = vmatprep.subr.mxu1 %v1749_v0  ;;  %1398 = vmatpush3.msra.mxu0 %v2055_v29 }
 0x121   : > { %1358 = vmatpush3.msra.mxu1 %v2220_v1  ;;  %1399 = vmatprep.subr.mxu0 %v1749_v0 }
 0x122   : > { %1359 = vmatprep.subr.mxu1 %v1749_v0  ;;  %1400 = vmatpush3.msra.mxu0 %v2065_v31 }
 0x123   : > { %1360 = vmatpush3.msra.mxu1 %v2227_v2  ;;  %1401 = vmatprep.subr.mxu0 %v1749_v0 }
 0x124   : > { %1361 = vmatprep.subr.mxu1 %v1749_v0  ;;  %1402 = vmatpush3.msra.mxu0 %v2075_v33 }
 0x125   : > { %1362 = vmatpush3.msra.mxu1 %v2236_v4  ;;  %1403 = vmatprep.subr.mxu0 %v1749_v0 }
 0x126   : > { %1363 = vmatprep.subr.mxu1 %v1749_v0  ;;  %1404 = vmatpush3.msra.mxu0 %v2085_v35 }
 0x127   : > { %1364 = vmatpush3.msra.mxu1 %v2245_v7  ;;  %1405 = vmatprep.subr.mxu0 %v1749_v0 }
 0x128   : > { %1366 = vmatmul.mubr.f32.vlgmr.msra.gmra.mxu1 %v380_v5  ;;  %1414 = vmatprep.subr.mxu1 %v1749_v0 }
 0x129   : > { %1415 = vmatpush3.msra.mxu1 %v1935_v6  ;;  %1406 = vmatpush3.msra.mxu0 %v2101_v37 }
 0x12a   : > { %1416 = vmatprep.subr.mxu1 %v1749_v0  ;;  %1407 = vmatprep.subr.mxu0 %v1749_v0 }
 0x12b   : > { %1417 = vmatpush3.msra.mxu1 %v1943_v8  ;;  %1446 = vmatprep.mubr.msk.f32.mxu1 %vm1750_vm0, %v1749_v0 }
 0x12c   : > { %1418 = vmatprep.subr.mxu1 %v1749_v0  ;;  %1408 = vmatpush3.msra.mxu0 %v2110_v39 }
 0x12d   : > { %1419 = vmatpush3.msra.mxu1 %v1960_v11  ;;  %1409 = vmatprep.subr.mxu0 %v1749_v0 }
 0x12e   : > { %1420 = vmatprep.subr.mxu1 %v1749_v0  ;;  %1410 = vmatpush3.msra.mxu0 %v2116_v40 }
 0x12f   : > { %1421 = vmatpush3.msra.mxu1 %v1977_v14  ;;  %1411 = vmatprep.mubr.msk.f32.mxu0 %vm1750_vm0, %v1749_v0 }
 0x130   : > { %1422 = vmatprep.subr.mxu1 %v1749_v0  ;;  %1449 = vmatprep.subr.mxu0 %v1749_v0 }
 0x131   : > { %1423 = vmatpush3.msra.mxu1 %v1987_v16 }
 0x132   : > { %1424 = vmatprep.subr.mxu1 %v1749_v0 }
 0x133   : > { %1425 = vmatpush3.msra.mxu1 %v1998_v18 }
 0x134   : > { %1426 = vmatprep.subr.mxu1 %v1749_v0 }
 0x135   : > { %1427 = vmatpush3.msra.mxu1 %v2008_v20 }
 0x136   : > { %1428 = vmatprep.subr.mxu1 %v1749_v0 }
 0x137   : > { %1429 = vmatpush3.msra.mxu1 %v2018_v22 }
 0x138   : > { %1430 = vmatprep.subr.mxu1 %v1749_v0 }
 0x139   : > { %1431 = vmatpush3.msra.mxu1 %v2028_v24 }
 0x13a   : > { %1432 = vmatprep.subr.mxu1 %v1749_v0 }
 0x13b   : > { %1433 = vmatpush3.msra.mxu1 %v2038_v26 }
 0x13c   : > { %1434 = vmatprep.subr.mxu1 %v1749_v0 }
 0x13d   : > { %1435 = vmatpush3.msra.mxu1 %v2048_v28 }
 0x13e   : > { %1436 = vmatprep.subr.mxu1 %v1749_v0 }
 0x13f   : > { %1437 = vmatpush3.msra.mxu1 %v2058_v30 }
 0x140   : > { %1438 = vmatprep.subr.mxu1 %v1749_v0 }
 0x141   : > { %1439 = vmatpush3.msra.mxu1 %v2068_v32 }
 0x142   : > { %1440 = vmatprep.subr.mxu1 %v1749_v0 }
 0x143   : > { %1441 = vmatpush3.msra.mxu1 %v2078_v34 }
 0x144   : > { %1442 = vmatprep.subr.mxu1 %v1749_v0 }
 0x145   : > { %1443 = vmatpush3.msra.mxu1 %v2088_v36 }
 0x146   : > { %1444 = vmatprep.subr.mxu1 %v1749_v0 }
 0x147   : > { %1445 = vmatpush3.msra.mxu1 %v2105_v38 }
 0x1c4   : > { %v551_v6 = vpop.f32.mrf.mxu0 }
 0x1c6   : > { %v1332_v8 = vpop.f32.mrf.mxu0 }
 0x1c8   : > { %v481_v9 = vpop.f32.mrf.mxu1  ;;  %v725_v10 = vpop.f32.mrf.mxu0 }
 0x1c9   : > { %v726_v11 = vadd.f32 %v725_v10, %v2120_v41  ;;  %v552_v19 = vadd.f32 %v551_v6, %v481_v9 }
 0x1ca   : > { %v1297_v12 = vpop.f32.mrf.mxu1  ;;  %v1372_v13 = vpop.f32.mrf.mxu0 }
 0x1cb   : > { %1447 = vmatmul.mubr.f32.vlgmr.msra.gmra.mxu1 %v726_v11 }
 0x1cc   : > { %v730_v14 = vpop.f32.mrf.mxu0 }
 0x1cd   : > { %v731_v15 = vadd.f32 %v730_v14, %v2124_v46 }
 0x1ce   : > { %v1375_v16 = vpop.f32.mrf.mxu0 }
 0x1cf   : > { %1412 = vmatmul.mubr.f32.vlgmr.msra.gmra.mxu0 %v731_v15 }
 0x1d0   : > { %1450 = vmatpush3.msra.mxu0 %v2131_v49  ;;  %v735_v17 = vpop.f32.mrf.mxu0  ;;  %1481 = vmatprep.mubr.msk.f32.mxu0 %vm1750_vm0, %v1749_v0 }
 0x1d1   : > { %1451 = vmatprep.subr.mxu0 %v1749_v0  ;;  %v736_v23 = vadd.f32 %v735_v17, %v2231_v3 }
 0x1d2   : > { %1452 = vmatpush3.msra.mxu0 %v2137_v51  ;;  %v1378_v18 = vpop.f32.mrf.mxu0 }
 0x1d3   : > { %1453 = vmatprep.subr.mxu0 %v1749_v0 }
 0x1d4   : > { %1454 = vmatpush3.msra.mxu0 %v2146_v53 }
 0x1d5   : > { %1455 = vmatprep.subr.mxu0 %v1749_v0 }
 0x1d6   : > { %1456 = vmatpush3.msra.mxu0 %v2156_v55 }
 0x1d7   : > { %1457 = vmatprep.subr.mxu0 %v1749_v0 }
 0x1d8   : > { %1458 = vmatpush3.msra.mxu0 %v2163_v56 }
 0x1d9   : > { %1459 = vmatprep.subr.mxu0 %v1749_v0 }
 0x1da   : > { %1460 = vmatpush3.msra.mxu0 %v2172_v57 }
 0x1db   : > { %1461 = vmatprep.subr.mxu0 %v1749_v0 }
 0x1dc   : > { %1462 = vmatpush3.msra.mxu0 %v2178_v58 }
 0x1dd   : > { %1463 = vmatprep.subr.mxu0 %v1749_v0 }
 0x1de   : > { %1464 = vmatpush3.msra.mxu0 %v2185_v59 }
 0x1df   : > { %1465 = vmatprep.subr.mxu0 %v1749_v0 }
 0x1e0   : > { %1466 = vmatpush3.msra.mxu0 %v2192_v60 }
 0x1e1   : > { %1467 = vmatprep.subr.mxu0 %v1749_v0 }
 0x1e2   : > { %1468 = vmatpush3.msra.mxu0 %v2199_v61 }
 0x1e3   : > { %1469 = vmatprep.subr.mxu0 %v1749_v0 }
 0x1e4   : > { %1470 = vmatpush3.msra.mxu0 %v2206_v62 }
 0x1e5   : > { %1471 = vmatprep.subr.mxu0 %v1749_v0 }
 0x1e6   : > { %1472 = vmatpush3.msra.mxu0 %v2213_v63 }
 0x1e7   : > { %1473 = vmatprep.subr.mxu0 %v1749_v0 }
 0x1e8   : > { %v637_v20 = vpop.f32.mrf.mxu1  ;;  %1474 = vmatpush3.msra.mxu0 %v2220_v1 }
 0x1e9   : > { %v641_v21 = vadd.f32 %v637_v20, %v552_v19  ;;  %1475 = vmatprep.subr.mxu0 %v1749_v0 }
 0x1ea   : > { %1476 = vmatpush3.msra.mxu0 %v2227_v2  ;;  %v1367_v22 = vpop.f32.mrf.mxu1 }
 0x1eb   : > { %642 = vst [vmem:[%s255_s27] sm:$0xff] %v641_v21  ;;  %1477 = vmatprep.subr.mxu0 %v1749_v0 }
 0x1ec   : > { %1478 = vmatpush3.msra.mxu0 %v2236_v4 }
 0x1ed   : > { %1479 = vmatprep.subr.mxu0 %v1749_v0 }
 0x1ee   : > { %1480 = vmatpush3.msra.mxu0 %v2245_v7 }
 0x1ef   : > { %1482 = vmatmul.mubr.f32.vlgmr.msra.gmra.mxu0 %v736_v23 }
 0x28b   : > { %v907_v24 = vpop.f32.mrf.mxu1 }
 0x28d   : > { %v1448_v25 = vpop.f32.mrf.mxu1 }
 0x28f   : > { %v837_v26 = vpop.f32.mrf.mxu0 }
 0x290   : > { %v908_v28 = vadd.f32 %v907_v24, %v837_v26 }
 0x291   : > { %v1413_v27 = vpop.f32.mrf.mxu0 }
 0x2af   : > { %v993_v29 = vpop.f32.mrf.mxu0 }
 0x2b0   : > { %v997_v30 = vadd.f32 %v993_v29, %v908_v28 }
 0x2b1   : > { %v1483_v0 = vpop.f32.mrf.mxu0 }
 0x2b2   : > { %998 = vst [vmem:[%s255_s27 + $0x8] sm:$0xff] %v997_v30 }
 0x2b3   : > { %1637 = shalt.err (!%p1634_p13)
}
 0x2b4   : > { %s1638_s10 = scalar_lea.hbm %s2340_s12, 256  ;;  %s1642_s7 = scalar_lea.hbm %s2401_s4, 1024 }
 0x2b5   : > { %p1639_p0 = scmp.ne.s32.totalorder %s2340_s12, %s1638_s10  ;;  %p1643_p4 = scmp.lt.s32.totalorder %s2340_s12, %s2401_s4 }
 0x2b6   : > { %p1644_p5 = scmp.lt.s32.totalorder %s1642_s7, %s1638_s10 }
 0x2b7   : > { %p1640_p1 = pnand %p1639_p0, %p1860_p12 }
 0x2b8   : > { %p1645_p7 = por %p1644_p5, %p1643_p4 }
 0x2b9   : > { %p1641_p6 = pneg %p1640_p1 }
 0x2bb   : > { %p1646_p8 = pnand %p1645_p7, %p1641_p6 }
 0x2bd   : > { %1649 = shalt.err (!%p1646_p8)
}
 0x2be   : > { %1489 = dma.vmem_to_hbm [thread:$0]  (%p1860_p12), %s1017_s18, 256, %s2340_s12, %s1000_s8  }
 0x2bf PF: > { %p1500_p9 = scmp.ge.s32.totalorder %s1744_s25, 2  ;;  %s1028_s26 = sand.u32 1, %s1704_s15  }
 0x2c0   : > { %s1029_s29 = scalar_lea.sflag [#allocation4], %s1028_s26 }
 0x2c1   : > { %p1496_p10 = pnand %p1500_p9, %p1873_p2 }
 0x2c3   : > { %p1497_p3 = pneg %p1496_p10 }
 0x2c5   : > { %1699 = dma.done.wait (%p1497_p3), %s1029_s29, 256  }
 0x2c6   : > { %1701 = vsyncadd (%p1497_p3), %s1029_s29, 4294967040  ;;  %s20_s25 = sadd.s32 1, %s1744_s25   ;;  %s2416_s11 = sld [smem:[#allocation12_spill]] }
 0x2c7   : > { %p17_p11 = scmp.ge.s32.totalorder %s20_s25, 6   ;;  %s2417_s21 = sld [smem:[#allocation8_spill]] }
 0x2c8   : > { %s2418_s22 = sld [smem:[#allocation9_spill]]  ;;  %s2421_s15 = smov %s1708_s16 }
 0x2c9   : > { %s2419_s23 = sld [smem:[#allocation10_spill]]  ;;  %s2422_s16 = smov %s1712_s17 }
 0x2ca   : > { %s2420_s24 = sld [smem:[#allocation11_spill]]  ;;  %s2423_s17 = smov %s1868_s13 }
 0x2cb   : > { %s2424_s18 = smov %s1720_s19  ;;  %s2425_s19 = smov %s1724_s20 }
 0x2cc   : > { %s2426_s20 = smov %s2416_s11  ;;  %19 = sbr.rel (!%p17_p11) target bundleno = 9 (0x9), region = 84 }
 0x2d1   :  { %1034 = vsyncpa [#allocation3], 1 }
 0x2d2   :  { %1036 = vsyncpa [#allocation3 + $0x1], 1 }
 0x2d3   :  { %1037 = vsyncpa [#allocation4], 1 }
 0x2d4   :  { %1039 = vsyncpa [#allocation4 + $0x1], 1 }

</bundles_post_ra>
